<compile_context>
chip_gen: v7x
topology: tpu7x:2x2x1
jax: 0.10.0
libtpu: 0.0.40
codegen_flags: <defaults>
</compile_context>

<pallas_src>
import functools

import jax
import jax.numpy as jnp
from jax.experimental import pallas as pl
from jax.experimental.pallas import tpu as pltpu

HIDDEN_LAYERS = [4, 8, 2]          # encoder: n_input -> 4 -> ReLU -> 8 -> ReLU -> 2
N_INPUT = 16                       # stand-in for len(parameters_scaled[0])
N_CLUSTERS = 2                     # KMeans(n_clusters=2)
LATENT = HIDDEN_LAYERS[-1]         # 2
ALPHA = 1.0                        # Student-t degrees of freedom

# Set to jnp.bfloat16 on v6e/v7x for MXU-native matmuls (loosen test tolerance
# to ~1e-2 if you do); f32 keeps the 1e-5 reference check exact.
MATMUL_DTYPE = jnp.float32


def dec_kernel(x_ref, w1_ref, b1_ref, w2_ref, b2_ref, w3_ref, b3_ref, c_ref, out_ref):
    # ---- encoder MLP: 3 matmuls (MXU, f32 accumulation) + ReLUs (VPU) ----
    x = x_ref[...].astype(MATMUL_DTYPE)                                   # (tb, n_input)
    h1 = jnp.maximum(
        jnp.dot(x, w1_ref[...], preferred_element_type=jnp.float32) + b1_ref[...], 0.0)
    h2 = jnp.maximum(
        jnp.dot(h1.astype(MATMUL_DTYPE), w2_ref[...],
                preferred_element_type=jnp.float32) + b2_ref[...], 0.0)
    z = jnp.dot(h2.astype(MATMUL_DTYPE), w3_ref[...],
                preferred_element_type=jnp.float32) + b3_ref[...]          # (tb, D) f32

    # ---- soft assignment (per-feature Student-t, no sum over feature dim,
    #      exactly as in the PyTorch reference) ----
    c = c_ref[...]                                                         # (K, D) f32
    num_clusters = c_ref.shape[0]                                          # static

    student_t = []
    for k in range(num_clusters):                                          # K is tiny: unroll
        dist = (z - c[k, :]) ** 2                                          # (tb, D)
        if ALPHA == 1.0:
            # (1 + dist)**(-1) == exact reciprocal (one EUP op, no pow chain)
            t = pl.reciprocal(1.0 + dist, approx=False)
        else:
            power = -(ALPHA + 1.0) / 2.0
            t = jnp.exp(power * jnp.log1p(dist / ALPHA))
        student_t.append(t)

    denom = student_t[0]
    for k in range(1, num_clusters):
        denom = denom + student_t[k]                                       # sum over clusters
    inv_denom = pl.reciprocal(denom, approx=False)                         # 1 recip + K muls

    # Lane-dense single store: (tb, K*D) slab, cluster-major along lanes, so a
    # contiguous wrapper reshape to (B, K, D) reproduces the reference layout.
    out_ref[...] = jnp.concatenate(
        [student_t[k] * inv_denom for k in range(num_clusters)], axis=-1)


def prepare_params(params, cluster_centres, matmul_dtype=MATMUL_DTYPE):
    """One-time prep: transpose weights to (in, out), reshape biases to (1, out),
    cast matmul operands. Keeps per-call graph free of tiny layout ops."""
    (w1, b1), (w2, b2), (w3, b3) = params
    return (
        w1.T.astype(matmul_dtype), b1.reshape(1, -1).astype(jnp.float32),
        w2.T.astype(matmul_dtype), b2.reshape(1, -1).astype(jnp.float32),
        w3.T.astype(matmul_dtype), b3.reshape(1, -1).astype(jnp.float32),
        cluster_centres.astype(jnp.float32),
    )


def _round_up(n, m):
    return ((n + m - 1) // m) * m


@functools.partial(jax.jit, static_argnames=("batch_tile",))
def dec_forward(x, prepped, batch_tile=512):
    """x: (B, N_INPUT) f32. Returns soft probabilities (B, K, D) f32."""
    w1, b1, w2, b2, w3, b3, centres = prepped
    B, n_in = x.shape
    K, D = centres.shape

    x = x.astype(jnp.float32)
    # Batch tiling: whole (padded) batch in one step when small, otherwise a
    # 1-D grid of batch_tile-row tiles (double-buffered HBM<->VMEM pipeline).
    if B <= batch_tile:
        tb = _round_up(B, 8)
    else:
        assert batch_tile % 8 == 0
        tb = batch_tile
    b_pad = _round_up(B, tb)
    if b_pad != B:
        x = jnp.pad(x, ((0, b_pad - B), (0, 0)))
    n_tiles = b_pad // tb

    rep = lambda shape: pl.BlockSpec(shape, lambda i: (0, 0))  # replicated operand

    out_flat = pl.pallas_call(
        dec_kernel,
        out_shape=jax.ShapeDtypeStruct((b_pad, K * D), jnp.float32),
        grid=(n_tiles,),
        in_specs=[
            pl.BlockSpec((tb, n_in), lambda i: (i, 0)),
            rep(w1.shape), rep(b1.shape),
            rep(w2.shape), rep(b2.shape),
            rep(w3.shape), rep(b3.shape),
            rep(centres.shape),
        ],
        out_specs=pl.BlockSpec((tb, K * D), lambda i: (i, 0)),
        compiler_params=pltpu.CompilerParams(
            dimension_semantics=("parallel",)),
    )(x, w1, b1, w2, b2, w3, b3, centres)

    return out_flat[:B].reshape(B, K, D)                 # contiguous reshape: free


def _init_linear(key, fan_in, fan_out):
    # deterministic stand-in for PyTorch's default uniform(-1/sqrt(fan_in), +1/sqrt(fan_in))
    kw, kb = jax.random.split(key)
    bound = 1.0 / jnp.sqrt(jnp.float32(fan_in))
    w = jax.random.uniform(kw, (fan_out, fan_in), jnp.float32, -bound, bound)
    b = jax.random.uniform(kb, (fan_out,), jnp.float32, -bound, bound)
    return w, b


def _reference_forward(x, params, centres):
    (w1, b1), (w2, b2), (w3, b3) = params
    h = jnp.maximum(x @ w1.T + b1, 0.0)
    h = jnp.maximum(h @ w2.T + b2, 0.0)
    z = h @ w3.T + b3
    dist = (z[:, None, :] - centres[None, :, :]) ** 2
    st = (1.0 + dist / ALPHA) ** (-(ALPHA + 1.0) / 2.0)
    return st / jnp.sum(st, axis=1, keepdims=True)


if __name__ == "__main__":
    key = jax.random.PRNGKey(0)
    k_x, k_c, k1, k2, k3 = jax.random.split(key, 5)

    B = 8
    x = jax.random.uniform(k_x, (B, N_INPUT), jnp.float32)               # MinMax-scaled-like inputs
    cluster_centres = jax.random.normal(k_c, (N_CLUSTERS, LATENT), jnp.float32) * 0.5

    params = [
        _init_linear(k1, N_INPUT, HIDDEN_LAYERS[0]),
        _init_linear(k2, HIDDEN_LAYERS[0], HIDDEN_LAYERS[1]),
        _init_linear(k3, HIDDEN_LAYERS[1], HIDDEN_LAYERS[2]),
    ]

    prepped = prepare_params(params, cluster_centres)                     # one-time prep
    out = dec_forward(x, prepped)
    out = jax.block_until_ready(out)

    ref = _reference_forward(x, params, cluster_centres)
    assert out.shape == (B, N_CLUSTERS, LATENT)
    assert jnp.allclose(out, ref, atol=1e-5, rtol=1e-5), "mismatch vs reference"

    print("KERNEL_OK")
</pallas_src>

<mosaic_0001>
module attributes {stable_mosaic.version = 11 : i64} {
  func.func @dec_kernel(%arg0: i32, %arg1: memref<8x16xf32, #tpu.memory_space<vmem>>, %arg2: memref<16x4xf32, #tpu.memory_space<vmem>>, %arg3: memref<1x4xf32, #tpu.memory_space<vmem>>, %arg4: memref<4x8xf32, #tpu.memory_space<vmem>>, %arg5: memref<1x8xf32, #tpu.memory_space<vmem>>, %arg6: memref<8x2xf32, #tpu.memory_space<vmem>>, %arg7: memref<1x2xf32, #tpu.memory_space<vmem>>, %arg8: memref<2x2xf32, #tpu.memory_space<vmem>>, %arg9: memref<8x4xf32, #tpu.memory_space<vmem>>) attributes {dimension_semantics = [#tpu.dimension_semantics<parallel>], iteration_bounds = array<i64: 1>, scalar_prefetch = 0 : i64, scratch_operands = 0 : i64, tpu.core_type = #tpu.core_type<tc>, window_params = [{transform_indices = @transform_0, window_bounds = array<i64: 8, 16>}, {pipeline_mode = #tpu.pipeline_mode<synchronous>, transform_indices = @transform_1, window_bounds = array<i64: 16, 4>}, {pipeline_mode = #tpu.pipeline_mode<synchronous>, transform_indices = @transform_2, window_bounds = array<i64: 1, 4>}, {pipeline_mode = #tpu.pipeline_mode<synchronous>, transform_indices = @transform_3, window_bounds = array<i64: 4, 8>}, {pipeline_mode = #tpu.pipeline_mode<synchronous>, transform_indices = @transform_4, window_bounds = array<i64: 1, 8>}, {pipeline_mode = #tpu.pipeline_mode<synchronous>, transform_indices = @transform_5, window_bounds = array<i64: 8, 2>}, {pipeline_mode = #tpu.pipeline_mode<synchronous>, transform_indices = @transform_6, window_bounds = array<i64: 1, 2>}, {pipeline_mode = #tpu.pipeline_mode<synchronous>, transform_indices = @transform_7, window_bounds = array<i64: 2, 2>}, {transform_indices = @transform_8, window_bounds = array<i64: 8, 4>}]} {
    %c0 = arith.constant 0 : index
    %c0_0 = arith.constant 0 : index
    %0 = vector.load %arg1[%c0, %c0_0] : memref<8x16xf32, #tpu.memory_space<vmem>>, vector<8x16xf32>
    %c0_1 = arith.constant 0 : index
    %c0_2 = arith.constant 0 : index
    %1 = vector.load %arg2[%c0_1, %c0_2] : memref<16x4xf32, #tpu.memory_space<vmem>>, vector<16x4xf32>
    %cst = arith.constant dense<0.000000e+00> : vector<8x4xf32>
    %2 = tpu.matmul %0, %1, %cst {dimension_numbers = #tpu.dot_dimension_numbers<[1], [0], [0], [1], [0, 0, 1, 1], [], []>} : vector<8x16xf32>, vector<16x4xf32>, vector<8x4xf32> -> vector<8x4xf32>
    %c0_3 = arith.constant 0 : index
    %c0_4 = arith.constant 0 : index
    %3 = vector.load %arg3[%c0_3, %c0_4] : memref<1x4xf32, #tpu.memory_space<vmem>>, vector<1x4xf32>
    %4 = vector.broadcast %3 : vector<1x4xf32> to vector<8x4xf32>
    %5 = arith.addf %2, %4 : vector<8x4xf32>
    %cst_5 = arith.constant 0.000000e+00 : f32
    %6 = vector.broadcast %cst_5 : f32 to vector<8x4xf32>
    %7 = arith.maximumf %5, %6 : vector<8x4xf32>
    %c0_6 = arith.constant 0 : index
    %c0_7 = arith.constant 0 : index
    %8 = vector.load %arg4[%c0_6, %c0_7] : memref<4x8xf32, #tpu.memory_space<vmem>>, vector<4x8xf32>
    %cst_8 = arith.constant dense<0.000000e+00> : vector<8x8xf32>
    %9 = tpu.matmul %7, %8, %cst_8 {dimension_numbers = #tpu.dot_dimension_numbers<[1], [0], [0], [1], [0, 0, 1, 1], [], []>} : vector<8x4xf32>, vector<4x8xf32>, vector<8x8xf32> -> vector<8x8xf32>
    %c0_9 = arith.constant 0 : index
    %c0_10 = arith.constant 0 : index
    %10 = vector.load %arg5[%c0_9, %c0_10] : memref<1x8xf32, #tpu.memory_space<vmem>>, vector<1x8xf32>
    %11 = vector.broadcast %10 : vector<1x8xf32> to vector<8x8xf32>
    %12 = arith.addf %9, %11 : vector<8x8xf32>
    %cst_11 = arith.constant 0.000000e+00 : f32
    %13 = vector.broadcast %cst_11 : f32 to vector<8x8xf32>
    %14 = arith.maximumf %12, %13 : vector<8x8xf32>
    %c0_12 = arith.constant 0 : index
    %c0_13 = arith.constant 0 : index
    %15 = vector.load %arg6[%c0_12, %c0_13] : memref<8x2xf32, #tpu.memory_space<vmem>>, vector<8x2xf32>
    %cst_14 = arith.constant dense<0.000000e+00> : vector<8x2xf32>
    %16 = tpu.matmul %14, %15, %cst_14 {dimension_numbers = #tpu.dot_dimension_numbers<[1], [0], [0], [1], [0, 0, 1, 1], [], []>} : vector<8x8xf32>, vector<8x2xf32>, vector<8x2xf32> -> vector<8x2xf32>
    %c0_15 = arith.constant 0 : index
    %c0_16 = arith.constant 0 : index
    %17 = vector.load %arg7[%c0_15, %c0_16] : memref<1x2xf32, #tpu.memory_space<vmem>>, vector<1x2xf32>
    %18 = vector.broadcast %17 : vector<1x2xf32> to vector<8x2xf32>
    %19 = arith.addf %16, %18 : vector<8x2xf32>
    %c0_17 = arith.constant 0 : index
    %c0_18 = arith.constant 0 : index
    %20 = vector.load %arg8[%c0_17, %c0_18] : memref<2x2xf32, #tpu.memory_space<vmem>>, vector<2x2xf32>
    %21 = vector.extract_strided_slice %20 {offsets = [0, 0], sizes = [1, 2], strides = [1, 1]} : vector<2x2xf32> to vector<1x2xf32>
    %22 = vector.shape_cast %21 : vector<1x2xf32> to vector<2xf32>
    %23 = vector.shape_cast %22 : vector<2xf32> to vector<1x2xf32>
    %24 = vector.broadcast %23 : vector<1x2xf32> to vector<8x2xf32>
    %25 = arith.subf %19, %24 : vector<8x2xf32>
    %26 = arith.mulf %25, %25 : vector<8x2xf32>
    %cst_19 = arith.constant 1.000000e+00 : f32
    %27 = vector.broadcast %cst_19 : f32 to vector<8x2xf32>
    %28 = arith.addf %27, %26 : vector<8x2xf32>
    %29 = tpu.reciprocal %28 : vector<8x2xf32> -> vector<8x2xf32>
    %30 = vector.extract_strided_slice %20 {offsets = [1, 0], sizes = [1, 2], strides = [1, 1]} : vector<2x2xf32> to vector<1x2xf32>
    %31 = vector.shape_cast %30 : vector<1x2xf32> to vector<2xf32>
    %32 = vector.shape_cast %31 : vector<2xf32> to vector<1x2xf32>
    %33 = vector.broadcast %32 : vector<1x2xf32> to vector<8x2xf32>
    %34 = arith.subf %19, %33 : vector<8x2xf32>
    %35 = arith.mulf %34, %34 : vector<8x2xf32>
    %cst_20 = arith.constant 1.000000e+00 : f32
    %36 = vector.broadcast %cst_20 : f32 to vector<8x2xf32>
    %37 = arith.addf %36, %35 : vector<8x2xf32>
    %38 = tpu.reciprocal %37 : vector<8x2xf32> -> vector<8x2xf32>
    %39 = arith.addf %29, %38 : vector<8x2xf32>
    %40 = tpu.reciprocal %39 : vector<8x2xf32> -> vector<8x2xf32>
    %41 = arith.mulf %29, %40 : vector<8x2xf32>
    %42 = arith.mulf %38, %40 : vector<8x2xf32>
    %43 = tpu.concatenate %41, %42 in 1 : vector<8x2xf32>, vector<8x2xf32> -> vector<8x4xf32>
    %c0_21 = arith.constant 0 : index
    %c0_22 = arith.constant 0 : index
    %44 = vector.load %arg9[%c0_21, %c0_22] : memref<8x4xf32, #tpu.memory_space<vmem>>, vector<8x4xf32>
    tpu.vector_store %arg9[%c0_21, %c0_22], %43 {strides = array<i32>} : memref<8x4xf32, #tpu.memory_space<vmem>>, vector<8x4xf32>,
    return
  }
  func.func @transform_0(%arg0: i32) -> (i32, i32) {
    %c0_i32 = arith.constant 0 : i32
    %c0_i32_0 = arith.constant 0 : i32
    return %arg0, %c0_i32 : i32, i32
  }
  func.func @transform_1(%arg0: i32) -> (i32, i32) {
    %c0_i32 = arith.constant 0 : i32
    %c0_i32_0 = arith.constant 0 : i32
    %c0_i32_1 = arith.constant 0 : i32
    return %c0_i32, %c0_i32_0 : i32, i32
  }
  func.func @transform_2(%arg0: i32) -> (i32, i32) {
    %c0_i32 = arith.constant 0 : i32
    %c0_i32_0 = arith.constant 0 : i32
    %c0_i32_1 = arith.constant 0 : i32
    return %c0_i32, %c0_i32_0 : i32, i32
  }
  func.func @transform_3(%arg0: i32) -> (i32, i32) {
    %c0_i32 = arith.constant 0 : i32
    %c0_i32_0 = arith.constant 0 : i32
    %c0_i32_1 = arith.constant 0 : i32
    return %c0_i32, %c0_i32_0 : i32, i32
  }
  func.func @transform_4(%arg0: i32) -> (i32, i32) {
    %c0_i32 = arith.constant 0 : i32
    %c0_i32_0 = arith.constant 0 : i32
    %c0_i32_1 = arith.constant 0 : i32
    return %c0_i32, %c0_i32_0 : i32, i32
  }
  func.func @transform_5(%arg0: i32) -> (i32, i32) {
    %c0_i32 = arith.constant 0 : i32
    %c0_i32_0 = arith.constant 0 : i32
    %c0_i32_1 = arith.constant 0 : i32
    return %c0_i32, %c0_i32_0 : i32, i32
  }
  func.func @transform_6(%arg0: i32) -> (i32, i32) {
    %c0_i32 = arith.constant 0 : i32
    %c0_i32_0 = arith.constant 0 : i32
    %c0_i32_1 = arith.constant 0 : i32
    return %c0_i32, %c0_i32_0 : i32, i32
  }
  func.func @transform_7(%arg0: i32) -> (i32, i32) {
    %c0_i32 = arith.constant 0 : i32
    %c0_i32_0 = arith.constant 0 : i32
    %c0_i32_1 = arith.constant 0 : i32
    return %c0_i32, %c0_i32_0 : i32, i32
  }
  func.func @transform_8(%arg0: i32) -> (i32, i32) {
    %c0_i32 = arith.constant 0 : i32
    %c0_i32_0 = arith.constant 0 : i32
    return %arg0, %c0_i32 : i32, i32
  }
}

</mosaic_0001>

<bundles_post_ra>
// kernel: dec_forward.1
= control target key start
LH: loop header
LB: loop body
LE: loop exit
PB: predicated region body
PF: predicated region fallthrough
CT: control target
= control target key end

     0   :  { %v359_v0 = vmov 0.0|0.0   ;;  %vm360_vm0 = vmmov 0   ;;  %v361_v3 = vmov 0.0   ;;  %vm39_vm1 = vcmask 130048   ;;  %s443_s1 = inlined_call_operand.vmem [shape: f32[16,4], index: 1, kind: input, shape index: {}]   ;;  %s444_s0 = inlined_call_operand.vmem [shape: f32[8,16], index: 0, kind: input, shape index: {}]   ;;  %s445_s3 = inlined_call_operand.vmem [shape: f32[4,8], index: 3, kind: input, shape index: {}]   ;;  %s446_s2 = inlined_call_operand.vmem [shape: f32[1,4], index: 2, kind: input, shape index: {}]   ;;  %s447_s5 = inlined_call_operand.vmem [shape: f32[8,2], index: 5, kind: input, shape index: {}]   ;;  %s448_s4 = inlined_call_operand.vmem [shape: f32[1,8], index: 4, kind: input, shape index: {}]   ;;  %s449_s7 = inlined_call_operand.vmem [shape: f32[2,2], index: 7, kind: input, shape index: {}]   ;;  %s450_s6 = inlined_call_operand.vmem [shape: f32[1,2], index: 6, kind: input, shape index: {}]   ;;  %s451_s8 = inlined_call_operand.vmem [shape: f32[8,4], index: 8, kind: output, shape index: {}]  }
   0x1   :  { %346 = vmatprep.subr.bf16.mxu0 %v359_v0  ;;  %v30_v1 = vld [vmem:[%s443_s1] sm:$0xff]  ;;  %v31_v2 = vld [vmem:[%s443_s1 + $0x8] sm:$0xff]  ;;  %333 = vmatprep.mubr.msk.f32.mxu0 %vm360_vm0, %v361_v3  ;;  %vm126_vm2 = vcmask 1043456   ;;  %vm122_vm3 = vcmask 31744   ;;  %vm209_vm4 = vcmask 64512   ;;  %v284_v18 = vlaneseq }
   0x2   :  { %v347_v4 = vpack.c.bf16 %v31_v2, %v30_v1  ;;  %336 = vmatprep.subr.mxu1 %v361_v3  ;;  %338 = vmatprep.mubr.msk.f32.mxu1 %vm360_vm0, %v361_v3  ;;  %v29_v5 = vld [vmem:[%s444_s0] sm:$0xff]  ;;  %vm308_vm5 = vcmask 15360  }
   0x3   :  { %v114_v6 = vld [vmem:[%s445_s3] sm:$0xf]  ;;  %v285_v19 = vshrl.u32 %v284_v18, 7 }
   0x4   :  { %348 = vmatpush3.bf16.msra.mxu0 %v347_v4  ;;  %337 = vmatpush3.msk.msra.mxu1 %vm126_vm2, %v114_v6  ;;  %v315_v7 = vld [vmem:[%s446_s2] ss:$0 sm:$0xff] }
   0x5   :  { %341 = vmatprep.subr.mxu1 %v361_v3  ;;  %v201_v12 = vld [vmem:[%s447_s5] sm:$0xff]  ;;  %v286_v20 = vsub.s32 0, %v285_v19  ;;  %v294_v21 = vsub.s32 1, %v285_v19 }
   0x6   :  { %v317_v13 = vld [vmem:[%s448_s4] ss:$0 sm:$0xff]  ;;  %s362_s4 = smov 2  }
   0x7   :  { %334 = vmatmul.mubr.msk.f32.vlgmr.msra.gmra.mrb[0].mxu0 %vm39_vm1, %v29_v5  ;;  %v283_v22 = vld [vmem:[%s449_s7] sm:$0x3] }
   0x8   :  { %v320_v23 = vld [vmem:[%s450_s6] ss:$0 sm:$0xff]  ;;  %v287_v24 = vrot.slane %v283_v22, %v286_v20  ;;  %v295_v25 = vrot.slane %v283_v22, %v294_v21 }
  0xda   :  { %v109_v8 = vpop.f32.mrb[0].mxu0 }
  0xdb   :  { %v110_v9 = vadd.f32 %v315_v7, %v109_v8  ;;  %v335_v10 = vpop.f32.mrb[1].mxu0 }
  0xdd   :  { %v113_v11 = vmax.f32 %v110_v9, 0.0 }
  0xdf   :  { %339 = vmatmul.mubr.msk.f32.vlgmr.msra.gmra.mrb[0].mxu1 %vm122_vm3, %v113_v11 }
  0xe0   :  { %343 = vmatprep.mubr.msk.f32.mxu1 %vm360_vm0, %v361_v3  ;;  %342 = vmatpush3.msra.mxu1 %v201_v12 }
 0x1b2   :  { %v196_v14 = vpop.f32.mrb[0].mxu1 }
 0x1b3   :  { %v197_v15 = vadd.f32 %v317_v13, %v196_v14  ;;  %v340_v16 = vpop.f32.mrb[1].mxu1 }
 0x1b5   :  { %v200_v17 = vmax.f32 %v197_v15, 0.0 }
 0x1b7   :  { %344 = vmatmul.mubr.msk.f32.vlgmr.msra.gmra.mrb[2].mxu1 %vm209_vm4, %v200_v17 }
 0x28a   :  { %v279_v26 = vpop.f32.mrb[2].mxu1 }
 0x28b   :  { %v280_v27 = vadd.f32 %v320_v23, %v279_v26  ;;  %v345_v28 = vpop.f32.mrb[3].mxu1 }
 0x28d   :  { %v288_v29 = vsub.f32 %v280_v27, %v287_v24  ;;  %v296_v30 = vsub.f32 %v280_v27, %v295_v25 }
 0x28f   :  { %v289_v31 = vmul.f32 %v288_v29, %v288_v29  ;;  %v297_v32 = vmul.f32 %v296_v30, %v296_v30 }
 0x291   :  { %v290_v33 = vadd.f32 1.0, %v289_v31  ;;  %v298_v34 = vadd.f32 1.0, %v297_v32 }
 0x293   :  { %353 = vrcp.f32 %v290_v33 }
 0x294   :  { %355 = vrcp.f32 %v298_v34 }
 0x29d   :  { %v354_v35 = vpop.eup %353 }
 0x29e   :  { %v356_v36 = vpop.eup %355 }
 0x29f   :  { %v300_v37 = vadd.f32 %v356_v36, %v354_v35 }
 0x2a1   :  { %357 = vrcp.f32 %v300_v37 }
 0x2ab   :  { %v358_v38 = vpop.eup %357 }
 0x2ac   :  { %v303_v39 = vmul.f32 %v358_v38, %v356_v36  ;;  %v302_v40 = vmul.f32 %v358_v38, %v354_v35 }
 0x2ae   :  { %305 = vrot.lane.b32.xlu0 %v303_v39, %s362_s4 }
 0x320   :  { %v306_v41 = vpop.permute.xlu0 %305 }
 0x321   :  { %v309_v42 = vsel %vm308_vm5, %v302_v40, %v306_v41 }
 0x322   :  { %310 = vst.msk [vmem:[%s451_s8] sm:$0xff] %vm122_vm3, %v309_v42 }

</bundles_post_ra>
